<compile_context>
chip_gen: v7x
topology: tpu7x:2x2x1
jax: 0.10.0
libtpu: 0.0.40
codegen_flags: <defaults>
</compile_context>

<pallas_src>
from functools import partial

import numpy as np
import jax
import jax.numpy as jnp
from jax.experimental import pallas as pl
from jax.experimental.pallas import tpu as pltpu

_EPS = 1e-8
_TILE_BYTES_TARGET = 4 * 1024 * 1024      # ~4 MiB per (G, TB, K) input block (real bytes)
_VMEM_LIMIT_BYTES = 48 * 1024 * 1024      # fits v5e/v6e (128 MiB) and v7x (64 MiB) VMEM


def _reduce_copy_kernel(x_ref, ocopy_ref, ostd_ref, acc_ref, *, k, group_size, inv_n):
    """Fused pass 1: copy x into channels [0, C) of the output and accumulate group std."""
    bt = pl.program_id(0)

    @pl.when(bt == 0)
    def _init():
        acc_ref[...] = jnp.zeros_like(acc_ref)
        ostd_ref[...] = jnp.zeros_like(ostd_ref)

    x = x_ref[...]                                   # (G, TB, K), original dtype
    ocopy_ref[:, :, 0:k] = x                         # copy-through (std channel filled in pass 2)

    xf = x.astype(jnp.float32)
    mean = jnp.mean(xf, axis=0)                      # (TB, K); group axis is leading -> VPU only
    diff = xf - mean
    var = jnp.sum(diff * diff, axis=0) * (1.0 / (group_size - 1))   # unbiased (ddof=1)
    std = jnp.sqrt(var + _EPS)                       # (TB, K), EUP
    acc_ref[...] = acc_ref[...] + std                # elementwise accumulate; no per-step reduce

    @pl.when(bt == pl.num_programs(0) - 1)
    def _finish():
        # Single cross-lane/sublane reduction + mean, done once.
        ostd_ref[...] = (jnp.sum(acc_ref[...]) * np.float32(inv_n)).reshape(1, 1)


def _fill_std_channel_kernel(std_ref, y_hbm_ref, o_ref):
    """Pass 2: splat the scalar std into channel C (output aliased with pass-1 output)."""
    del y_hbm_ref  # present only so pallas_call can alias its buffer with the output
    s = std_ref[0, 0].astype(o_ref.dtype)
    o_ref[...] = jnp.broadcast_to(s, o_ref.shape)


def _pick_batch_tile(bg, g, k, elem_bytes=4, target_bytes=_TILE_BYTES_TARGET):
    """Largest layout-legal batch-row tile: divides bg and (multiple of 8 or == bg)."""
    per_row = g * k * elem_bytes
    max_tb = max(1, target_bytes // per_row)
    candidates = [d for d in range(1, bg + 1)
                  if bg % d == 0 and (d % 8 == 0 or d == bg)]
    fitting = [d for d in candidates if d <= max_tb]
    return max(fitting) if fitting else min(candidates)


def _pick_fill_tile(bg, g, hw, elem_bytes=4, target_bytes=_TILE_BYTES_TARGET):
    per_row = g * hw * elem_bytes
    max_tb = max(1, target_bytes // per_row)
    best = 1
    for d in range(1, bg + 1):
        if bg % d == 0 and d <= max_tb:
            best = d
    return best


def _minibatch_std_forward(x, group_size):
    B, C, H, W = x.shape
    G = group_size
    assert G >= 2 and B % G == 0
    BG = B // G
    HW = H * W
    K = C * HW                    # flattened per-(group, batch-row) feature length
    KP = K + HW                   # same row with the extra std channel appended

    # Contiguous view of torch's x.view(G, -1): row g covers batches [g*BG, (g+1)*BG).
    x3 = x.reshape(G, BG, K)

    TB = _pick_batch_tile(BG, G, K)
    num_bt = BG // TB
    inv_n = 1.0 / float(BG * K)   # mean over all N = B*C*H*W / G columns

    # TODO(synk): extremely large C*H*W (block over VMEM even at the smallest legal batch
    # tile) would need an extra K-tiling grid axis; typical MiniBatchStd shapes do not.

    copy_out, std_scalar = pl.pallas_call(
        partial(_reduce_copy_kernel, k=K, group_size=G, inv_n=inv_n),
        out_shape=(jax.ShapeDtypeStruct((G, BG, KP), x.dtype),
                   jax.ShapeDtypeStruct((1, 1), jnp.float32)),
        grid=(num_bt,),
        in_specs=[pl.BlockSpec((G, TB, K), lambda bt: (0, bt, 0))],
        out_specs=(pl.BlockSpec((G, TB, KP), lambda bt: (0, bt, 0)),
                   pl.BlockSpec((1, 1), lambda bt: (0, 0))),
        scratch_shapes=[pltpu.VMEM((TB, K), jnp.float32)],
        compiler_params=pltpu.CompilerParams(
            # NOTE: the single reduction axis runs on one TensorCore; a v7x-specific 2-way
            # split with per-core partial accumulators could ~2x pass 1 there.
            dimension_semantics=("arbitrary",),
            vmem_limit_bytes=_VMEM_LIMIT_BYTES),
    )(x3)

    # Pass 2: fill channel C in place.  5-D view keeps the block's trailing dims equal to
    # the full array dims (legal for any H*W); the reshape is a free bitcast under jit.
    y5 = copy_out.reshape(G, BG, C + 1, 1, HW)
    TB2 = _pick_fill_tile(BG, G, HW)
    out5 = pl.pallas_call(
        _fill_std_channel_kernel,
        out_shape=jax.ShapeDtypeStruct((G, BG, C + 1, 1, HW), x.dtype),
        grid=(BG // TB2,),
        in_specs=[pl.BlockSpec(memory_space=pltpu.MemorySpace.SMEM),   # scalar std
                  pl.BlockSpec(memory_space=pl.ANY)],                  # aliased output buffer
        out_specs=pl.BlockSpec(
            (G, TB2, pl.Squeezed(), pl.Squeezed(), HW),
            lambda b: (0, b, C, 0, 0)),
        input_output_aliases={1: 0},
        compiler_params=pltpu.CompilerParams(
            dimension_semantics=("parallel",),
            vmem_limit_bytes=_VMEM_LIMIT_BYTES),
    )(std_scalar, y5)

    return out5.reshape(B, C + 1, H, W)


minibatch_std_forward = jax.jit(_minibatch_std_forward, static_argnames=("group_size",))


if __name__ == "__main__":
    key = jax.random.PRNGKey(0)
    B, C, H, W = 4, 4, 16, 16
    group_size = 2
    x = jax.random.normal(key, (B, C, H, W), dtype=jnp.float32)

    out = minibatch_std_forward(x, group_size=group_size)
    out = jax.block_until_ready(out)
    assert out.shape == (B, C + 1, H, W)

    # Pure-JAX reference mirroring the PyTorch module exactly
    # (torch.var default is unbiased -> ddof=1).
    grouped = x.reshape(group_size, -1)
    std = jnp.sqrt(jnp.var(grouped, axis=0, ddof=1) + 1e-8)
    s = jnp.mean(std)
    ref = jnp.concatenate([x, jnp.full((B, 1, H, W), s, dtype=x.dtype)], axis=1)

    np.testing.assert_allclose(np.asarray(out), np.asarray(ref), rtol=1e-5, atol=1e-6)
    print("KERNEL_OK")
</pallas_src>

<mosaic_0001>
module attributes {stable_mosaic.version = 11 : i64} {
  func.func @_fill_std_channel_kernel(%arg0: i32, %arg1: memref<1x1xf32, #tpu.memory_space<smem>>, %arg2: memref<2x2x5x1x256xf32, #tpu.memory_space<any>>, %arg3: memref<2x2x1x1x256xf32, #tpu.memory_space<vmem>>) attributes {dimension_semantics = [#tpu.dimension_semantics<parallel>], iteration_bounds = array<i64: 1>, scalar_prefetch = 0 : i64, scratch_operands = 0 : i64, tpu.core_type = #tpu.core_type<tc>, window_params = [{transform_indices = @transform_0, window_bounds = array<i64: 1, 1>}, {}, {transform_indices = @transform_2, window_bounds = array<i64: 2, 2, 1, 1, 256>}]} {
    %c0 = arith.constant 0 : index
    %c0_0 = arith.constant 0 : index
    %0 = memref.load %arg1[%c0, %c0_0] : memref<1x1xf32, #tpu.memory_space<smem>>
    %1 = vector.broadcast %0 : f32 to vector<2x2x256xf32>
    %c0_1 = arith.constant 0 : index
    %c0_2 = arith.constant 0 : index
    %c0_3 = arith.constant 0 : index
    %c0_4 = arith.constant 0 : index
    %c0_5 = arith.constant 0 : index
    %2 = vector.load %arg3[%c0_1, %c0_2, %c0_3, %c0_4, %c0_5] : memref<2x2x1x1x256xf32, #tpu.memory_space<vmem>>, vector<2x2x1x1x256xf32>
    %3 = vector.shape_cast %2 : vector<2x2x1x1x256xf32> to vector<2x2x256xf32>
    %4 = vector.shape_cast %1 : vector<2x2x256xf32> to vector<2x2x1x1x256xf32>
    tpu.vector_store %arg3[%c0_1, %c0_2, %c0_3, %c0_4, %c0_5], %4 {strides = array<i32>} : memref<2x2x1x1x256xf32, #tpu.memory_space<vmem>>, vector<2x2x1x1x256xf32>,
    return
  }
  func.func @transform_0(%arg0: i32) -> (i32, i32) {
    %c0_i32 = arith.constant 0 : i32
    %c0_i32_0 = arith.constant 0 : i32
    %c0_i32_1 = arith.constant 0 : i32
    return %c0_i32, %c0_i32_0 : i32, i32
  }
  func.func @transform_2(%arg0: i32) -> (i32, i32, i32, i32, i32) {
    %c0_i32 = arith.constant 0 : i32
    %c4_i32 = arith.constant 4 : i32
    %c0_i32_0 = arith.constant 0 : i32
    %c0_i32_1 = arith.constant 0 : i32
    %c0_i32_2 = arith.constant 0 : i32
    return %c0_i32, %arg0, %c4_i32, %c0_i32_0, %c0_i32_1 : i32, i32, i32, i32, i32
  }
}

module attributes {stable_mosaic.version = 11 : i64} {
  func.func @_reduce_copy_kernel(%arg0: i32, %arg1: memref<2x2x1024xf32, #tpu.memory_space<vmem>>, %arg2: memref<2x2x1280xf32, #tpu.memory_space<vmem>>, %arg3: memref<1x1xf32, #tpu.memory_space<vmem>>, %arg4: memref<2x1024xf32, #tpu.memory_space<vmem>>) attributes {dimension_semantics = [#tpu.dimension_semantics<arbitrary>], iteration_bounds = array<i64: 1>, scalar_prefetch = 0 : i64, scratch_operands = 1 : i64, tpu.core_type = #tpu.core_type<tc>, window_params = [{transform_indices = @transform_0, window_bounds = array<i64: 2, 2, 1024>}, {transform_indices = @transform_1, window_bounds = array<i64: 2, 2, 1280>}, {pipeline_mode = #tpu.pipeline_mode<synchronous>, transform_indices = @transform_2, window_bounds = array<i64: 1, 1>}]} {
    %c0_i32 = arith.constant 0 : i32
    %0 = arith.cmpi eq, %arg0, %c0_i32 : i32
    %1 = arith.extui %0 : i1 to i32
    %c0_i32_0 = arith.constant 0 : i32
    %2 = arith.cmpi ne, %1, %c0_i32_0 : i32
    scf.if %2 {
      %cst_16 = arith.constant 0.000000e+00 : f32
      %24 = vector.broadcast %cst_16 : f32 to vector<2x1024xf32>
      %c0_17 = arith.constant 0 : index
      %c0_18 = arith.constant 0 : index
      %25 = vector.load %arg4[%c0_17, %c0_18] : memref<2x1024xf32, #tpu.memory_space<vmem>>, vector<2x1024xf32>
      tpu.vector_store %arg4[%c0_17, %c0_18], %24 {strides = array<i32>} : memref<2x1024xf32, #tpu.memory_space<vmem>>, vector<2x1024xf32>,
      %cst_19 = arith.constant 0.000000e+00 : f32
      %26 = vector.broadcast %cst_19 : f32 to vector<1x1xf32>
      %c0_20 = arith.constant 0 : index
      %c0_21 = arith.constant 0 : index
      %27 = vector.load %arg3[%c0_20, %c0_21] : memref<1x1xf32, #tpu.memory_space<vmem>>, vector<1x1xf32>
      tpu.vector_store %arg3[%c0_20, %c0_21], %26 {strides = array<i32>} : memref<1x1xf32, #tpu.memory_space<vmem>>, vector<1x1xf32>,
    } else {
    }
    %c0 = arith.constant 0 : index
    %c0_1 = arith.constant 0 : index
    %c0_2 = arith.constant 0 : index
    %3 = vector.load %arg1[%c0, %c0_1, %c0_2] : memref<2x2x1024xf32, #tpu.memory_space<vmem>>, vector<2x2x1024xf32>
    %c0_3 = arith.constant 0 : index
    %c0_4 = arith.constant 0 : index
    %c0_5 = arith.constant 0 : index
    %4 = vector.load %arg2[%c0_3, %c0_4, %c0_5] : memref<2x2x1280xf32, #tpu.memory_space<vmem>>, vector<2x2x1024xf32>
    tpu.vector_store %arg2[%c0_3, %c0_4, %c0_5], %3 {strides = array<i32>} : memref<2x2x1280xf32, #tpu.memory_space<vmem>>, vector<2x2x1024xf32>,
    %cst = arith.constant dense<0.000000e+00> : vector<2x1024xf32>
    %5 = vector.multi_reduction <add>, %3, %cst [0] : vector<2x2x1024xf32> to vector<2x1024xf32>
    %cst_6 = arith.constant 2.000000e+00 : f32
    %6 = vector.broadcast %cst_6 : f32 to vector<2x1024xf32>
    %7 = arith.divf %5, %6 : vector<2x1024xf32>
    %8 = vector.shape_cast %7 : vector<2x1024xf32> to vector<1x2x1024xf32>
    %9 = vector.broadcast %8 : vector<1x2x1024xf32> to vector<2x2x1024xf32>
    %10 = arith.subf %3, %9 : vector<2x2x1024xf32>
    %11 = arith.mulf %10, %10 : vector<2x2x1024xf32>
    %cst_7 = arith.constant dense<0.000000e+00> : vector<2x1024xf32>
    %12 = vector.multi_reduction <add>, %11, %cst_7 [0] : vector<2x2x1024xf32> to vector<2x1024xf32>
    %cst_8 = arith.constant 1.000000e+00 : f32
    %13 = vector.broadcast %cst_8 : f32 to vector<2x1024xf32>
    %14 = arith.mulf %12, %13 : vector<2x1024xf32>
    %cst_9 = arith.constant 9.99999993E-9 : f32
    %15 = vector.broadcast %cst_9 : f32 to vector<2x1024xf32>
    %16 = arith.addf %14, %15 : vector<2x1024xf32>
    %17 = math.sqrt %16 : vector<2x1024xf32>
    %c0_10 = arith.constant 0 : index
    %c0_11 = arith.constant 0 : index
    %18 = vector.load %arg4[%c0_10, %c0_11] : memref<2x1024xf32, #tpu.memory_space<vmem>>, vector<2x1024xf32>
    %19 = arith.addf %18, %17 : vector<2x1024xf32>
    %c0_12 = arith.constant 0 : index
    %c0_13 = arith.constant 0 : index
    %20 = vector.load %arg4[%c0_12, %c0_13] : memref<2x1024xf32, #tpu.memory_space<vmem>>, vector<2x1024xf32>
    tpu.vector_store %arg4[%c0_12, %c0_13], %19 {strides = array<i32>} : memref<2x1024xf32, #tpu.memory_space<vmem>>, vector<2x1024xf32>,
    %c0_i32_14 = arith.constant 0 : i32
    %21 = arith.cmpi eq, %arg0, %c0_i32_14 : i32
    %22 = arith.extui %21 : i1 to i32
    %c0_i32_15 = arith.constant 0 : i32
    %23 = arith.cmpi ne, %22, %c0_i32_15 : i32
    scf.if %23 {
      %c0_16 = arith.constant 0 : index
      %c0_17 = arith.constant 0 : index
      %24 = vector.load %arg4[%c0_16, %c0_17] : memref<2x1024xf32, #tpu.memory_space<vmem>>, vector<2x1024xf32>
      %25 = vector.shape_cast %24 : vector<2x1024xf32> to vector<1x2x1024xf32>
      %cst_18 = arith.constant dense<0.000000e+00> : vector<1xf32>
      %26 = vector.multi_reduction <add>, %25, %cst_18 [1, 2] : vector<1x2x1024xf32> to vector<1xf32>
      %27 = vector.shape_cast %26 : vector<1xf32> to vector<1x1x1xf32>
      %28 = vector.extract %27[0, 0, 0] : f32 from vector<1x1x1xf32>
      %cst_19 = arith.constant 4.8828125E-4 : f32
      %29 = arith.mulf %28, %cst_19 : f32
      %30 = vector.broadcast %29 : f32 to vector<1x1xf32>
      %c0_20 = arith.constant 0 : index
      %c0_21 = arith.constant 0 : index
      %31 = vector.load %arg3[%c0_20, %c0_21] : memref<1x1xf32, #tpu.memory_space<vmem>>, vector<1x1xf32>
      tpu.vector_store %arg3[%c0_20, %c0_21], %30 {strides = array<i32>} : memref<1x1xf32, #tpu.memory_space<vmem>>, vector<1x1xf32>,
    } else {
    }
    return
  }
  func.func @transform_0(%arg0: i32) -> (i32, i32, i32) {
    %c0_i32 = arith.constant 0 : i32
    %c0_i32_0 = arith.constant 0 : i32
    %c0_i32_1 = arith.constant 0 : i32
    return %c0_i32, %arg0, %c0_i32_0 : i32, i32, i32
  }
  func.func @transform_1(%arg0: i32) -> (i32, i32, i32) {
    %c0_i32 = arith.constant 0 : i32
    %c0_i32_0 = arith.constant 0 : i32
    %c0_i32_1 = arith.constant 0 : i32
    return %c0_i32, %arg0, %c0_i32_0 : i32, i32, i32
  }
  func.func @transform_2(%arg0: i32) -> (i32, i32) {
    %c0_i32 = arith.constant 0 : i32
    %c0_i32_0 = arith.constant 0 : i32
    %c0_i32_1 = arith.constant 0 : i32
    return %c0_i32, %c0_i32_0 : i32, i32
  }
}

</mosaic_0001>

<bundles_post_ra>
// kernel: _minibatch_std_forward.3
= control target key start
LH: loop header
LB: loop body
LE: loop exit
PB: predicated region body
PF: predicated region fallthrough
CT: control target
= control target key end

     0   :  { %v12_v1 = vlaneseq  ;;  %s114_s0 = inlined_call_operand.<no memory space> [shape: f32[1,1], index: 0, kind: input, shape index: {}]   ;;  %s115_s1 = inlined_call_operand.vmem [shape: f32[2,2,5,1,256], index: 1, kind: input, shape index: {}, may-alias: {1,2}]   ;;  %s116_s2 = inlined_call_operand.vmem [shape: f32[2,2,5,1,256], index: 2, kind: output, shape index: {}, may-alias: {1,2}]  }
   0x1   :  { %v11_v0 = vstv %s114_s0 }
   0x2   :  { %vm14_vm0 = vcmp.lt.s32.totalorder %v12_v1, 256 }
   0x3   :  { %16 = vst.msk [vmem:[#allocation3] sm:$0x3] %vm14_vm0, %v11_v0  ;;  %17 = vst.msk [vmem:[#allocation3 + $0x2] sm:$0x3] %vm14_vm0, %v11_v0 }
   0x4   :  { %18 = vst.msk [vmem:[#allocation3 + $0x4] sm:$0x3] %vm14_vm0, %v11_v0  ;;  %19 = vst.msk [vmem:[#allocation3 + $0x6] sm:$0x3] %vm14_vm0, %v11_v0 }
   0xa   :  { %v38_v2 = vld [vmem:[#allocation3] sm:$0x3]  ;;  %v40_v3 = vld [vmem:[#allocation3 + $0x2] sm:$0x3] }
   0xb   :  { %v42_v4 = vld [vmem:[#allocation3 + $0x4] sm:$0x3]  ;;  %80 = vst [vmem:[%s116_s2 + $0x8] sm:$0x3] %v38_v2  ;;  %81 = vst [vmem:[%s116_s2 + $0x12] sm:$0x3] %v40_v3 }
   0xc   :  { %82 = vst [vmem:[%s116_s2 + $0x1c] sm:$0x3] %v42_v4  ;;  %v44_v5 = vld [vmem:[#allocation3 + $0x6] sm:$0x3] }
   0xd   :  { %83 = vst [vmem:[%s116_s2 + $0x26] sm:$0x3] %v44_v5 }

// kernel: _minibatch_std_forward.2
= control target key start
LH: loop header
LB: loop body
LE: loop exit
PB: predicated region body
PF: predicated region fallthrough
CT: control target
= control target key end

     0   :  { %v35_v3 = vlaneseq  ;;  %v573_v5 = vmov 1983009808   ;;  %s773_s0 = inlined_call_operand.vmem [shape: f32[2,2,1024], index: 0, kind: input, shape index: {}]   ;;  %s774_s1 = inlined_call_operand.vmem [shape: f32[2,2,1280], index: 1, kind: output, shape index: {0}]   ;;  %s775_s2 = inlined_call_operand.hbm [shape: f32[1,1], index: 2, kind: output, shape index: {1}]  }
   0x1   :  { %v594_v0 = vld [vmem:[%s773_s0] sm:$0xff]  ;;  %v599_v1 = vld [vmem:[%s773_s0 + $0x8] sm:$0xff]  ;;  %v604_v2 = vld [vmem:[%s773_s0 + $0x10] sm:$0xff]  ;;  %v33_v6 = vunpack.c.l.s4 %v573_v5 }
   0x2   :  { %v609_v4 = vld [vmem:[%s773_s0 + $0x18] sm:$0xff]  ;;  %23 = vst [vmem:[%s774_s1] sm:$0xff] %v594_v0  ;;  %24 = vst [vmem:[%s774_s1 + $0x8] sm:$0xff] %v599_v1 }
   0x3   :  { %25 = vst [vmem:[%s774_s1 + $0x14] sm:$0xff] %v604_v2 }
   0x4   :  { %8 = vsyncpa [#allocation4], 0  ;;  %26 = vst [vmem:[%s774_s1 + $0x1c] sm:$0xff] %v609_v4  ;;  %v36_v7 = vshrl.u32 %v35_v3, 7  ;;  %v31_v8 = vcombine.high %v594_v0, %v594_v0  ;;  %v34_v9 = vunpack.c.0.s8 %v33_v6  ;;  %v48_v10 = vcombine.high %v599_v1, %v599_v1  ;;  %s575_s1 = smov [#allocation3]  }
   0x5   :  { %v65_v11 = vcombine.high %v604_v2, %v604_v2  ;;  %v82_v12 = vcombine.high %v609_v4, %v609_v4  ;;  %vm115_vm0 = vcmask 1041408   ;;  %s512_s24 = sshll.u32 %s575_s1, 4  ;;  %s513_s24 = int_to_ptr.vmem [resolvable:$true] %s512_s24 }
   0x6   :  { %v635_v13 = vsub.s32 %v34_v9, %v36_v7  ;;  %s549_s27 = scalar_lea.vmem %s513_s24, 16  ;;  %s553_s28 = scalar_lea.vmem %s513_s24, 32 }
   0x7   :  { %p550_p0 = scmp.ne.s32.totalorder %s513_s24, %s549_s27  ;;  %p554_p1 = scmp.lt.s32.totalorder %s513_s24, %s513_s24 }
   0x8   :  { %v38_v14 = vrot.slane %v594_v0, %v635_v13  ;;  %v45_v15 = vrot.slane %v31_v8, %v635_v13  ;;  %v55_v16 = vrot.slane %v599_v1, %v635_v13  ;;  %v62_v17 = vrot.slane %v48_v10, %v635_v13  ;;  %p555_p2 = scmp.lt.s32.totalorder %s553_s28, %s549_s27 }
   0x9   :  { %v72_v18 = vrot.slane %v604_v2, %v635_v13  ;;  %v79_v19 = vrot.slane %v65_v11, %v635_v13  ;;  %v89_v20 = vrot.slane %v609_v4, %v635_v13  ;;  %v96_v21 = vrot.slane %v82_v12, %v635_v13 }
   0xa   :  { %v46_v22 = vcombine.high %v38_v14, %v38_v14  ;;  %v47_v23 = vcombine.high %v45_v15, %v45_v15  ;;  %v63_v24 = vcombine.high %v55_v16, %v55_v16  ;;  %v64_v25 = vcombine.high %v62_v17, %v62_v17  ;;  %p556_p3 = por %p555_p2, %p554_p1 }
   0xb   :  { %v80_v26 = vcombine.high %v72_v18, %v72_v18  ;;  %v81_v27 = vcombine.high %v79_v19, %v79_v19  ;;  %v97_v28 = vcombine.high %v89_v20, %v89_v20  ;;  %v98_v29 = vcombine.high %v96_v21, %v96_v21 }
   0xc   :  { %v116_v30 = vsel %vm115_vm0, %v38_v14, 0.0  ;;  %v117_v31 = vsel %vm115_vm0, %v72_v18, 0.0  ;;  %v119_v32 = vsel %vm115_vm0, %v46_v22, 0.0  ;;  %v122_v33 = vsel %vm115_vm0, %v45_v15, 0.0  ;;  %p557_p4 = pnand %p556_p3, %p550_p0 }
   0xd   :  { %v118_v34 = vadd.f32 %v117_v31, %v116_v30  ;;  %v120_v35 = vsel %vm115_vm0, %v80_v26, 0.0  ;;  %v123_v36 = vsel %vm115_vm0, %v79_v19, 0.0  ;;  %v125_v37 = vsel %vm115_vm0, %v47_v23, 0.0 }
   0xe   :  { %v121_v38 = vadd.f32 %v120_v35, %v119_v32  ;;  %v124_v39 = vadd.f32 %v123_v36, %v122_v33  ;;  %v126_v40 = vsel %vm115_vm0, %v81_v27, 0.0  ;;  %v128_v41 = vsel %vm115_vm0, %v55_v16, 0.0 }
   0xf   :  { %v127_v42 = vadd.f32 %v126_v40, %v125_v37  ;;  %v129_v43 = vsel %vm115_vm0, %v89_v20, 0.0  ;;  %v131_v44 = vsel %vm115_vm0, %v63_v24, 0.0  ;;  %v132_v45 = vsel %vm115_vm0, %v97_v28, 0.0 }
  0x10   :  { %v130_v46 = vadd.f32 %v129_v43, %v128_v41  ;;  %v133_v47 = vadd.f32 %v132_v45, %v131_v44  ;;  %v134_v48 = vsel %vm115_vm0, %v62_v17, 0.0  ;;  %v135_v49 = vsel %vm115_vm0, %v96_v21, 0.0 }
  0x11   :  { %v136_v50 = vadd.f32 %v135_v49, %v134_v48  ;;  %v137_v51 = vsel %vm115_vm0, %v64_v25, 0.0  ;;  %v138_v52 = vsel %vm115_vm0, %v98_v29, 0.0  ;;  %v141_v53 = vmul.f32 0.5, %v118_v34 }
  0x12   :  { %v139_v54 = vadd.f32 %v138_v52, %v137_v51  ;;  %v142_v55 = vmul.f32 0.5, %v121_v38  ;;  %v143_v56 = vmul.f32 0.5, %v124_v39  ;;  %v144_v57 = vmul.f32 0.5, %v127_v42 }
  0x13   :  { %v145_v58 = vmul.f32 0.5, %v130_v46  ;;  %v146_v59 = vmul.f32 0.5, %v133_v47  ;;  %v147_v60 = vmul.f32 0.5, %v136_v50 }
  0x14   :  { %v148_v61 = vmul.f32 0.5, %v139_v54  ;;  %v157_v62 = vcombine.low %v141_v53, %v142_v55  ;;  %v158_v63 = vcombine.low %v143_v56, %v144_v57 }
  0x15   :  { %v174_v3 = vcombine.low %v145_v58, %v146_v59 }
  0x16   :  { %v165_v5 = vrot.slane %v157_v62, %v635_v13  ;;  %v172_v6 = vrot.slane %v158_v63, %v635_v13  ;;  %v175_v7 = vcombine.low %v147_v60, %v148_v61 }
  0x17   :  { %v182_v8 = vrot.slane %v174_v3, %v635_v13 }
  0x18   :  { %v173_v9 = vcombine.low %v165_v5, %v172_v6  ;;  %v189_v10 = vrot.slane %v175_v7, %v635_v13 }
  0x1a   :  { %v190_v11 = vcombine.low %v182_v8, %v189_v10  ;;  %v193_v12 = vsub.f32 %v594_v0, %v173_v9  ;;  %v195_v14 = vsub.f32 %v604_v2, %v173_v9 }
  0x1c   :  { %v194_v15 = vsub.f32 %v599_v1, %v190_v11  ;;  %v196_v16 = vsub.f32 %v609_v4, %v190_v11  ;;  %v197_v17 = vmul.f32 %v193_v12, %v193_v12  ;;  %v199_v18 = vmul.f32 %v195_v14, %v195_v14 }
  0x1e   :  { %v198_v19 = vmul.f32 %v194_v15, %v194_v15  ;;  %v200_v20 = vmul.f32 %v196_v16, %v196_v16  ;;  %v205_v21 = vcombine.high %v197_v17, %v197_v17  ;;  %v212_v22 = vrot.slane %v197_v17, %v635_v13 }
  0x1f   :  { %v239_v23 = vcombine.high %v199_v18, %v199_v18  ;;  %v246_v24 = vrot.slane %v199_v18, %v635_v13 }
  0x20   :  { %v219_v25 = vrot.slane %v205_v21, %v635_v13  ;;  %v220_v26 = vcombine.high %v212_v22, %v212_v22  ;;  %v222_v0 = vcombine.high %v198_v19, %v198_v19  ;;  %v229_v2 = vrot.slane %v198_v19, %v635_v13 }
  0x21   :  { %v253_v1 = vrot.slane %v239_v23, %v635_v13  ;;  %v254_v27 = vcombine.high %v246_v24, %v246_v24  ;;  %v256_v4 = vcombine.high %v200_v20, %v200_v20  ;;  %v263_v28 = vrot.slane %v200_v20, %v635_v13 }
  0x22   :  { %v221_v29 = vcombine.high %v219_v25, %v219_v25  ;;  %v236_v30 = vrot.slane %v222_v0, %v635_v13  ;;  %v237_v31 = vcombine.high %v229_v2, %v229_v2  ;;  %v289_v32 = vsel %vm115_vm0, %v212_v22, 0.0 }
  0x23   :  { %v255_v33 = vcombine.high %v253_v1, %v253_v1  ;;  %v270_v34 = vrot.slane %v256_v4, %v635_v13  ;;  %v271_v35 = vcombine.high %v263_v28, %v263_v28  ;;  %v290_v36 = vsel %vm115_vm0, %v246_v24, 0.0 }
  0x24   :  { %v238_v37 = vcombine.high %v236_v30, %v236_v30  ;;  %v291_v38 = vadd.f32 %v290_v36, %v289_v32  ;;  %v292_v39 = vsel %vm115_vm0, %v220_v26, 0.0  ;;  %v293_v40 = vsel %vm115_vm0, %v254_v27, 0.0 }
  0x25   :  { %v272_v41 = vcombine.high %v270_v34, %v270_v34  ;;  %v294_v42 = vadd.f32 %v293_v40, %v292_v39  ;;  %v295_v43 = vsel %vm115_vm0, %v219_v25, 0.0  ;;  %v296_v44 = vsel %vm115_vm0, %v253_v1, 0.0 }
  0x26   :  { %v297_v45 = vadd.f32 %v296_v44, %v295_v43  ;;  %v298_v46 = vsel %vm115_vm0, %v221_v29, 0.0  ;;  %v299_v47 = vsel %vm115_vm0, %v255_v33, 0.0  ;;  %v301_v48 = vsel %vm115_vm0, %v229_v2, 0.0 }
  0x27   :  { %v300_v49 = vadd.f32 %v299_v47, %v298_v46  ;;  %v302_v50 = vsel %vm115_vm0, %v263_v28, 0.0  ;;  %v304_v51 = vsel %vm115_vm0, %v237_v31, 0.0  ;;  %v305_v52 = vsel %vm115_vm0, %v271_v35, 0.0 }
  0x28   :  { %v303_v53 = vadd.f32 %v302_v50, %v301_v48  ;;  %v307_v54 = vsel %vm115_vm0, %v236_v30, 0.0  ;;  %v308_v55 = vsel %vm115_vm0, %v270_v34, 0.0  ;;  %v306_v56 = vadd.f32 %v305_v52, %v304_v51 }
  0x29   :  { %v310_v57 = vsel %vm115_vm0, %v238_v37, 0.0  ;;  %v311_v58 = vsel %vm115_vm0, %v272_v41, 0.0  ;;  %v313_v59 = vadd.f32 1e-08, %v291_v38  ;;  %v309_v60 = vadd.f32 %v308_v55, %v307_v54 }
  0x2a   :  { %v314_v61 = vadd.f32 1e-08, %v294_v42  ;;  %v315_v62 = vadd.f32 1e-08, %v297_v45  ;;  %v312_v63 = vadd.f32 %v311_v58, %v310_v57  ;;  %v316_v3 = vadd.f32 1e-08, %v300_v49 }
  0x2b   :  { %533 = vrsqrt.f32 %v313_v59  ;;  %v317_v5 = vadd.f32 1e-08, %v303_v53  ;;  %v697_v6 = vadd.f32 1e-08, %v306_v56  ;;  %v699_v7 = vadd.f32 1e-08, %v309_v60 }
  0x2c   :  { %535 = vrsqrt.f32 %v314_v61  ;;  %v701_v8 = vadd.f32 1e-08, %v312_v63  ;;  %vm323_vm1 = vcmp.eq.f32.partialorder %v313_v59, inf  ;;  %vm325_vm2 = vcmp.eq.f32.partialorder %v313_v59, 0.0 }
  0x2d   :  { %537 = vrsqrt.f32 %v315_v62  ;;  %v326_v9 = vand.u32 2147483648, %v313_v59  ;;  %vm330_vm3 = vcmp.eq.f32.partialorder %v314_v61, inf  ;;  %vm332_vm4 = vcmp.eq.f32.partialorder %v314_v61, 0.0 }
  0x2e   :  { %539 = vrsqrt.f32 %v316_v3  ;;  %v333_v11 = vand.u32 2147483648, %v314_v61  ;;  %vm337_vm5 = vcmp.eq.f32.partialorder %v315_v62, inf  ;;  %vm339_vm6 = vcmp.eq.f32.partialorder %v315_v62, 0.0 }
  0x2f   :  { %541 = vrsqrt.f32 %v317_v5  ;;  %v340_v12 = vand.u32 2147483648, %v315_v62  ;;  %vm344_vm7 = vcmp.eq.f32.partialorder %v316_v3, inf  ;;  %vm346_vm8 = vcmp.eq.f32.partialorder %v316_v3, 0.0 }
  0x30   :  { %543 = vrsqrt.f32 %v697_v6  ;;  %v347_v15 = vand.u32 2147483648, %v316_v3  ;;  %vm351_vm9 = vcmp.eq.f32.partialorder %v317_v5, inf  ;;  %vm353_vm10 = vcmp.eq.f32.partialorder %v317_v5, 0.0 }
  0x31   :  { %545 = vrsqrt.f32 %v699_v7  ;;  %v354_v17 = vand.u32 2147483648, %v317_v5  ;;  %vm358_vm11 = vcmp.eq.f32.partialorder %v697_v6, inf  ;;  %vm360_vm12 = vcmp.eq.f32.partialorder %v697_v6, 0.0 }
  0x32   :  { %547 = vrsqrt.f32 %v701_v8  ;;  %v361_v21 = vand.u32 2147483648, %v697_v6  ;;  %vm365_vm13 = vcmp.eq.f32.partialorder %v699_v7, inf  ;;  %vm367_vm14 = vcmp.eq.f32.partialorder %v699_v7, 0.0 }
  0x33   :  { %v368_v2 = vand.u32 2147483648, %v699_v7  ;;  %vm372_vm15 = vcmp.eq.f32.partialorder %v701_v8, inf  ;;  %v375_v38 = vand.u32 2147483648, %v701_v8 }
  0x35   :  { %v534_v10 = vpop.eup %533 }
  0x36   :  { %v322_v14 = vmul.f32 %v534_v10, %v313_v59  ;;  %v536_v16 = vpop.eup %535 }
  0x37   :  { %v538_v18 = vpop.eup %537  ;;  %v329_v20 = vmul.f32 %v536_v16, %v314_v61 }
  0x38   :  { %v324_v19 = vsel %vm323_vm1, %v313_v59, %v322_v14  ;;  %v540_v22 = vpop.eup %539  ;;  %v336_v24 = vmul.f32 %v538_v18, %v315_v62  ;;  %vm374_vm1 = vcmp.eq.f32.partialorder %v701_v8, 0.0 }
  0x39   :  { %v327_v23 = vsel %vm325_vm2, %v326_v9, %v324_v19  ;;  %v542_v25 = vpop.eup %541  ;;  %v331_v26 = vsel %vm330_vm3, %v314_v61, %v329_v20  ;;  %v343_v0 = vmul.f32 %v540_v22, %v316_v3  ;;  %vm17_vm2 = vcmask 0  }
  0x3a   :  { %v544_v1 = vpop.eup %543  ;;  %v334_v27 = vsel %vm332_vm4, %v333_v11, %v331_v26  ;;  %v338_v4 = vsel %vm337_vm5, %v315_v62, %v336_v24  ;;  %v350_v28 = vmul.f32 %v542_v25, %v317_v5 }
  0x3b   :  { %v546_v29 = vpop.eup %545  ;;  %v341_v30 = vsel %vm339_vm6, %v340_v12, %v338_v4  ;;  %v345_v31 = vsel %vm344_vm7, %v316_v3, %v343_v0  ;;  %v357_v32 = vmul.f32 %v544_v1, %v697_v6  ;;  %v387_v33 = vcombine.low %v327_v23, %v334_v27 }
  0x3c   :  { %v548_v34 = vpop.eup %547  ;;  %v348_v35 = vsel %vm346_vm8, %v347_v15, %v345_v31  ;;  %v352_v36 = vsel %vm351_vm9, %v317_v5, %v350_v28  ;;  %v364_v37 = vmul.f32 %v546_v29, %v699_v7 }
  0x3d   :  { %v355_v39 = vsel %vm353_vm10, %v354_v17, %v352_v36  ;;  %v359_v40 = vsel %vm358_vm11, %v697_v6, %v357_v32  ;;  %v371_v41 = vmul.f32 %v548_v34, %v701_v8  ;;  %v388_v42 = vcombine.low %v341_v30, %v348_v35 }
  0x3e   :  { %v362_v43 = vsel %vm360_vm12, %v361_v21, %v359_v40  ;;  %v366_v44 = vsel %vm365_vm13, %v699_v7, %v364_v37  ;;  %v395_v45 = vrot.slane %v387_v33, %v635_v13 }
  0x3f   :  { %v369_v46 = vsel %vm367_vm14, %v368_v2, %v366_v44  ;;  %v373_v47 = vsel %vm372_vm15, %v701_v8, %v371_v41  ;;  %v402_v48 = vrot.slane %v388_v42, %v635_v13  ;;  %v404_v49 = vcombine.low %v355_v39, %v362_v43 }
  0x40   :  { %v376_v50 = vsel %vm374_vm1, %v375_v38, %v373_v47 }
  0x41   :  { %v403_v51 = vcombine.low %v395_v45, %v402_v48  ;;  %v405_v52 = vcombine.low %v369_v46, %v376_v50  ;;  %v412_v53 = vrot.slane %v404_v49, %v635_v13  ;;  %v522_v54 = vcombine.low %v402_v48, %v402_v48 }
  0x43   :  { %v419_v55 = vrot.slane %v405_v52, %v635_v13  ;;  %v441_v56 = vrot.slane %v403_v51, %v635_v13  ;;  %v448_v57 = vrot.slane %v522_v54, %v635_v13 }
  0x45   :  { %v420_v58 = vcombine.low %v412_v53, %v419_v55  ;;  %v449_v59 = vcombine.high %v441_v56, %v441_v56  ;;  %v450_v60 = vcombine.high %v448_v57, %v448_v57  ;;  %v523_v61 = vcombine.low %v419_v55, %v419_v55 }
  0x46   :  { %v476_v62 = vsel %vm115_vm0, %v441_v56, 0.0  ;;  %v479_v5 = vsel %vm115_vm0, %v448_v57, 0.0 }
  0x47   :  { %v458_v63 = vrot.slane %v420_v58, %v635_v13  ;;  %v477_v3 = vsel %vm115_vm0, %v449_v59, 0.0  ;;  %v465_v7 = vrot.slane %v523_v61, %v635_v13  ;;  %v481_v9 = vsel %vm115_vm0, %v450_v60, 0.0 }
  0x48   :  { %v478_v6 = vadd.f32 %v477_v3, %v476_v62  ;;  %v574_v13 = vmov 0.0  }
  0x49   :  { %v466_v8 = vcombine.high %v458_v63, %v458_v63  ;;  %v483_v11 = vsel %vm115_vm0, %v458_v63, 0.0  ;;  %v467_v14 = vcombine.high %v465_v7, %v465_v7  ;;  %v487_v17 = vsel %vm115_vm0, %v465_v7, 0.0  ;;  %18 = vst.msk [vmem:[#allocation3] sm:$0x1] %vm17_vm2, %v574_v13 }
  0x4a   :  { %v480_v10 = vadd.f32 %v479_v5, %v478_v6 }
  0x4b   :  { %v485_v15 = vsel %vm115_vm0, %v466_v8, 0.0  ;;  %v489_v19 = vsel %vm115_vm0, %v467_v14, 0.0 }
  0x4c   :  { %v482_v12 = vadd.f32 %v481_v9, %v480_v10 }
  0x4e   :  { %v484_v16 = vadd.f32 %v483_v11, %v482_v12 }
  0x50   :  { %v486_v18 = vadd.f32 %v485_v15, %v484_v16 }
  0x52   :  { %v488_v20 = vadd.f32 %v487_v17, %v486_v18 }
  0x54   :  { %v490_v21 = vadd.f32 %v489_v19, %v488_v20 }
  0x56   :  { %491 = vadd.xlane.f32.xlu0 %v490_v21 }
  0xe3   :  { %v492_v22 = vpop.xlane.xlu0 %491 }
  0xe4   :  { %v493_v23 = vrot.slane %v492_v22, 4 }
  0xe6   :  { %v494_v24 = vadd.f32 %v493_v23, %v492_v22 }
  0xe8   :  { %v495_v25 = vrot.slane %v494_v24, 2 }
  0xea   :  { %v496_v26 = vadd.f32 %v495_v25, %v494_v24 }
  0xec   :  { %v497_v0 = vrot.slane %v496_v26, 1 }
  0xee   :  { %v498_v2 = vadd.f32 %v497_v0, %v496_v26 }
  0xf0   :  { %524 = vpush %v498_v2 }
 0x121   :  { %s525_s25 = spop %524 }
 0x122   :  { %s500_s26 = smul.f32 0.00048828125, %s525_s25 }
 0x124   :  { %v501_v1 = vstv %s500_s26 }
 0x125   :  { %503 = vst.msk [vmem:[#allocation3] sm:$0x1] %vm17_vm2, %v501_v1 }
 0x126   :  { %560 = shalt.err (!%p557_p4)
}
 0x127   :  { %s561_s3 = scalar_lea.hbm %s775_s2, 16 }
 0x128   :  { %p562_p5 = scmp.ne.s32.totalorder %s775_s2, %s561_s3  ;;  %p565_p6 = scmp.lt.u32.totalorder %s561_s3, %s775_s2 }
 0x12a   :  { %p567_p7 = pnand %p565_p6, %p562_p5 }
 0x12c   :  { %570 = shalt.err (!%p567_p7)
}
 0x12d   :  { %515 = dma.vmem_to_hbm [thread:$0]  %s513_s24, 16, %s775_s2, [#allocation4]  }
 0x12e   :  { %571 = dma.done.wait [#allocation4], 16  }
 0x12f   :  { %572 = vsyncadd [#allocation4], 4294967280 }
 0x130   :  { %521 = vsyncpa [#allocation4], 1 }

</bundles_post_ra>
